<compile_context>
chip_gen: v7x
topology: tpu7x:2x2x1
jax: 0.10.0
libtpu: 0.0.40
codegen_flags: <defaults>
</compile_context>

<pallas_src>
import math

import jax
import jax.numpy as jnp
from jax.experimental import pallas as pl
from jax.experimental.pallas import tpu as pltpu


# 48 MiB: > default scoped limits (16 MiB v5e / 32 MiB v6e,v7x), < v7x 64 MiB
# physical VMEM.  Re-derive downward only if tiles are grown aggressively.
_VMEM_LIMIT = 48 * 1024 * 1024


def _pick_tile(n, cap, mult):
    """Largest t dividing n with t <= cap and t % mult == 0; else n (full dim)."""
    if n <= cap:
        return n
    for t in range(cap, 0, -1):
        if n % t == 0 and t % mult == 0:
            return t
    return n


# --------------------------- QKV projection ----------------------------------
# grid = (B, S // TMs, h); h innermost ("arbitrary") so the activation tile's
# block index is unchanged across heads and Pallas skips its re-DMA.

def _qkv_proj_kernel(xq_ref, xk_ref, xv_ref,
                     wq_ref, wk_ref, wv_ref, bq_ref, bk_ref, bv_ref,
                     qo_ref, ko_ref, vo_ref):
    hh = pl.program_id(2)
    qo_ref[...] = (jnp.dot(xq_ref[...], wq_ref[hh],
                           preferred_element_type=jnp.float32)
                   + bq_ref[hh]).astype(qo_ref.dtype)
    ko_ref[...] = (jnp.dot(xk_ref[...], wk_ref[hh],
                           preferred_element_type=jnp.float32)
                   + bk_ref[hh]).astype(ko_ref.dtype)
    vo_ref[...] = (jnp.dot(xv_ref[...], wv_ref[hh],
                           preferred_element_type=jnp.float32)
                   + bv_ref[hh]).astype(vo_ref.dtype)


def _qkv_proj_self_kernel(x_ref,
                          wq_ref, wk_ref, wv_ref, bq_ref, bk_ref, bv_ref,
                          qo_ref, ko_ref, vo_ref):
    # self-attention: one activation stream, reused for all three projections
    hh = pl.program_id(2)
    x = x_ref[...]
    qo_ref[...] = (jnp.dot(x, wq_ref[hh], preferred_element_type=jnp.float32)
                   + bq_ref[hh]).astype(qo_ref.dtype)
    ko_ref[...] = (jnp.dot(x, wk_ref[hh], preferred_element_type=jnp.float32)
                   + bk_ref[hh]).astype(ko_ref.dtype)
    vo_ref[...] = (jnp.dot(x, wv_ref[hh], preferred_element_type=jnp.float32)
                   + bv_ref[hh]).astype(vo_ref.dtype)


def pallas_qkv_projection(xq, xk, xv, wq_h, wk_h, wv_h, bq_h, bk_h, bv_h,
                          *, seq_block=512):
    """xq/xk/xv: (B, S, D) bf16; w*_h: (h, D, d_k) bf16 (resident);
    b*_h: (h, 1, d_k) f32.  Returns three (B, h, S, d_k) bf16 arrays
    (head-split layout, no XLA transposes)."""
    B, S, D = xq.shape
    h, _, d_k = wq_h.shape
    TMs = _pick_tile(S, seq_block, 8)
    same = (xq is xk) and (xq is xv)

    x_spec = pl.BlockSpec((None, TMs, D), lambda b, si, hh: (b, si, 0))
    w_spec = pl.BlockSpec((h, D, d_k), lambda b, si, hh: (0, 0, 0))   # resident
    b_spec = pl.BlockSpec((h, 1, d_k), lambda b, si, hh: (0, 0, 0))   # resident
    o_spec = pl.BlockSpec((None, None, TMs, d_k),
                          lambda b, si, hh: (b, hh, si, 0))
    out_shape = tuple(jax.ShapeDtypeStruct((B, h, S, d_k), jnp.bfloat16)
                      for _ in range(3))
    grid = (B, S // TMs, h)
    cp = pltpu.CompilerParams(
        dimension_semantics=("parallel", "parallel", "arbitrary"),
        vmem_limit_bytes=_VMEM_LIMIT)

    if same:
        return pl.pallas_call(
            _qkv_proj_self_kernel, out_shape=out_shape, grid=grid,
            in_specs=[x_spec, w_spec, w_spec, w_spec, b_spec, b_spec, b_spec],
            out_specs=(o_spec, o_spec, o_spec), compiler_params=cp,
        )(xq, wq_h, wk_h, wv_h, bq_h, bk_h, bv_h)
    return pl.pallas_call(
        _qkv_proj_kernel, out_shape=out_shape, grid=grid,
        in_specs=[x_spec, x_spec, x_spec,
                  w_spec, w_spec, w_spec, b_spec, b_spec, b_spec],
        out_specs=(o_spec, o_spec, o_spec), compiler_params=cp,
    )(xq, xk, xv, wq_h, wk_h, wv_h, bq_h, bk_h, bv_h)


# --------------------------- Flash attention (hot path) ----------------------
# grid = (B*h, S // Tq, S // Tk); online softmax over the kv axis, so the
# (S, S) score tensor is never materialized and VMEM stays O(Tq * Tk).

def _flash_attn_kernel(q_ref, k_ref, v_ref, mask_ref, o_ref,
                       m_ref, l_ref, acc_ref):
    ki = pl.program_id(2)

    @pl.when(ki == 0)
    def _():
        m_ref[...] = jnp.full(m_ref.shape, -jnp.inf, m_ref.dtype)
        l_ref[...] = jnp.zeros_like(l_ref)
        acc_ref[...] = jnp.zeros_like(acc_ref)

    # q already carries the 1/sqrt(d_k) scale (folded into wq/bq at init)
    s = jnp.dot(q_ref[...], k_ref[...].T, preferred_element_type=jnp.float32)
    s = s + mask_ref[...].astype(jnp.float32)          # additive mask (0 / -1e9)

    m_prev = m_ref[...]
    m_new = jnp.maximum(m_prev, jnp.max(s, axis=-1, keepdims=True))
    alpha = jnp.exp(m_prev - m_new)
    p = jnp.exp(s - m_new)
    l_ref[...] = alpha * l_ref[...] + jnp.sum(p, axis=-1, keepdims=True)
    acc_ref[...] = alpha * acc_ref[...] + jnp.dot(
        p.astype(jnp.bfloat16), v_ref[...], preferred_element_type=jnp.float32)
    m_ref[...] = m_new

    @pl.when(ki == pl.num_programs(2) - 1)
    def _():
        o_ref[...] = (acc_ref[...]
                      * pl.reciprocal(l_ref[...], approx=True)).astype(o_ref.dtype)


def pallas_flash_attention(qh, kh, vh, mask_add, *, q_block=256, kv_block=256):
    """qh/kh/vh: (B*h, S, d_k) bf16 (q pre-scaled); mask_add: (S, S) bf16.
    Returns the attention context (B*h, S, d_k) in bf16."""
    BH, S, d_k = qh.shape
    Tq = _pick_tile(S, q_block, 8)
    Tk = _pick_tile(S, kv_block, 128)   # mask tile lane dim: mult of 128 or S
    return pl.pallas_call(
        _flash_attn_kernel,
        out_shape=jax.ShapeDtypeStruct((BH, S, d_k), jnp.bfloat16),
        grid=(BH, S // Tq, S // Tk),
        in_specs=[
            pl.BlockSpec((None, Tq, d_k), lambda bh, qi, ki: (bh, qi, 0)),
            pl.BlockSpec((None, Tk, d_k), lambda bh, qi, ki: (bh, ki, 0)),
            pl.BlockSpec((None, Tk, d_k), lambda bh, qi, ki: (bh, ki, 0)),
            pl.BlockSpec((Tq, Tk), lambda bh, qi, ki: (qi, ki)),
        ],
        out_specs=pl.BlockSpec((None, Tq, d_k), lambda bh, qi, ki: (bh, qi, 0)),
        scratch_shapes=[
            pltpu.VMEM((Tq, 1), jnp.float32),     # running max
            pltpu.VMEM((Tq, 1), jnp.float32),     # running sum
            pltpu.VMEM((Tq, d_k), jnp.float32),   # context accumulator
        ],
        compiler_params=pltpu.CompilerParams(
            dimension_semantics=("parallel", "parallel", "arbitrary"),
            vmem_limit_bytes=_VMEM_LIMIT),
    )(qh, kh, vh, mask_add)


# --------------------------- Attention with probabilities (debug path) -------

def _attn_probs_kernel(q_ref, k_ref, v_ref, mask_ref, o_ref, p_ref):
    s = jnp.dot(q_ref[...], k_ref[...].T, preferred_element_type=jnp.float32)
    s = s + mask_ref[...].astype(jnp.float32)
    m = jnp.max(s, axis=-1, keepdims=True)
    e = jnp.exp(s - m)
    p = e / jnp.sum(e, axis=-1, keepdims=True)          # exact: parity w/ self.attn
    p_ref[...] = p
    o_ref[...] = jnp.dot(p.astype(jnp.bfloat16), v_ref[...],
                         preferred_element_type=jnp.float32).astype(o_ref.dtype)


def pallas_attention_with_probs(qh, kh, vh, mask_add):
    """Debug path (return_attn=True): materializes (B*h, S, S) probabilities.
    Off the hot path; uses full-S blocks (VMEM-heavy for large S)."""
    BH, S, d_k = qh.shape
    ctx, probs = pl.pallas_call(
        _attn_probs_kernel,
        out_shape=(jax.ShapeDtypeStruct((BH, S, d_k), jnp.bfloat16),
                   jax.ShapeDtypeStruct((BH, S, S), jnp.float32)),
        grid=(BH,),
        in_specs=[
            pl.BlockSpec((None, S, d_k), lambda bh: (bh, 0, 0)),
            pl.BlockSpec((None, S, d_k), lambda bh: (bh, 0, 0)),
            pl.BlockSpec((None, S, d_k), lambda bh: (bh, 0, 0)),
            pl.BlockSpec((S, S), lambda bh: (0, 0)),
        ],
        out_specs=(pl.BlockSpec((None, S, d_k), lambda bh: (bh, 0, 0)),
                   pl.BlockSpec((None, S, S), lambda bh: (bh, 0, 0))),
        compiler_params=pltpu.CompilerParams(
            dimension_semantics=("parallel",),
            vmem_limit_bytes=_VMEM_LIMIT),
    )(qh, kh, vh, mask_add)
    return ctx, probs


# --------------------------- Output projection --------------------------------
# grid = (B, S // TMs, h); reduction over heads (innermost, "arbitrary") into a
# lane-dense (TMs, D) f32 accumulator -> no XLA head-merge transpose.

def _out_proj_kernel(x_ref, w_ref, b_ref, o_ref, acc_ref):
    hh = pl.program_id(2)

    @pl.when(hh == 0)
    def _():
        acc_ref[...] = jnp.zeros_like(acc_ref)

    acc_ref[...] += jnp.dot(x_ref[...], w_ref[hh],
                            preferred_element_type=jnp.float32)

    @pl.when(hh == pl.num_programs(2) - 1)
    def _():
        o_ref[...] = acc_ref[...] + b_ref[...]


def pallas_output_projection(xh, wo_h, bo, *, seq_block=512):
    """xh: (B, h, S, d_k) bf16 context; wo_h: (h, d_k, D) bf16 (resident);
    bo: (1, D) f32.  Returns (B, S, D) f32."""
    B, h, S, d_k = xh.shape
    D = wo_h.shape[-1]
    TMs = _pick_tile(S, seq_block, 8)
    return pl.pallas_call(
        _out_proj_kernel,
        out_shape=jax.ShapeDtypeStruct((B, S, D), jnp.float32),
        grid=(B, S // TMs, h),
        in_specs=[
            pl.BlockSpec((None, None, TMs, d_k), lambda b, si, hh: (b, hh, si, 0)),
            pl.BlockSpec((h, d_k, D), lambda b, si, hh: (0, 0, 0)),   # resident
            pl.BlockSpec((1, D), lambda b, si, hh: (0, 0)),           # resident
        ],
        out_specs=pl.BlockSpec((None, TMs, D), lambda b, si, hh: (b, si, 0)),
        scratch_shapes=[pltpu.VMEM((TMs, D), jnp.float32)],
        compiler_params=pltpu.CompilerParams(
            dimension_semantics=("parallel", "parallel", "arbitrary"),
            vmem_limit_bytes=_VMEM_LIMIT),
    )(xh, wo_h, bo)


# --------------------------- Params / module wrapper --------------------------

def init_mha_params(key, d_model, h):
    """4 linear layers (Wq, Wk, Wv, Wo), xavier_uniform weights, zero bias.

    Raw f32 weights are stored as (d_in, d_out) for the reference; kernel
    weights are pre-packed ONCE here: head-split, cast to bf16, with the
    1/sqrt(d_k) attention scale folded into wq / bq.
    """
    assert d_model % h == 0
    d_k = d_model // h
    bound = math.sqrt(6.0 / (d_model + d_model))
    keys = jax.random.split(key, 4)
    params = {}
    for name, k in zip(("q", "k", "v", "o"), keys):
        w_pt = jax.random.uniform(k, (d_model, d_model), jnp.float32,
                                  minval=-bound, maxval=bound)  # torch (out, in)
        params["w" + name] = jnp.transpose(w_pt)                # (in, out)
        params["b" + name] = jnp.zeros((d_model,), jnp.float32)

    scale = 1.0 / math.sqrt(d_k)

    def split_w(w, s=1.0):   # (D, D) -> (h, D, d_k) bf16
        return (w * s).reshape(d_model, h, d_k).transpose(1, 0, 2).astype(jnp.bfloat16)

    def split_b(b, s=1.0):   # (D,) -> (h, 1, d_k) f32
        return (b * s).reshape(h, 1, d_k).astype(jnp.float32)

    params.update({
        "wq_h": split_w(params["wq"], scale),   # scale folded into q projection
        "wk_h": split_w(params["wk"]),
        "wv_h": split_w(params["wv"]),
        "bq_h": split_b(params["bq"], scale),
        "bk_h": split_b(params["bk"]),
        "bv_h": split_b(params["bv"]),
        "wo_h": params["wo"].reshape(h, d_k, d_model).astype(jnp.bfloat16),
        "bo": params["bo"].reshape(1, d_model),
    })
    return params


def multi_headed_attention(params, query, key, value, mask, h, *, return_attn=False):
    """query/key/value: (S, B, d_model) f32; mask: (S, S) int.

    Returns (out (S, B, d_model) f32, attn (B, h, S, S) f32 or None), matching
    the PyTorch module's returned value and stored self.attn.
    """
    S, B, D = query.shape
    assert D % h == 0
    d_k = D // h

    # seq-first -> batch-first (matches torch .transpose(1, 0)); the bf16 cast
    # is fused into the same XLA pass so kernels read half the HBM bytes.
    same_qkv = (query is key) and (query is value)
    xq = jnp.transpose(query, (1, 0, 2)).astype(jnp.bfloat16)
    if same_qkv:
        xk = xv = xq
    else:
        xk = jnp.transpose(key, (1, 0, 2)).astype(jnp.bfloat16)
        xv = jnp.transpose(value, (1, 0, 2)).astype(jnp.bfloat16)

    # fused QKV projection -> head-split (B, h, S, d_k) bf16 (no XLA transposes)
    qh, kh, vh = pallas_qkv_projection(
        xq, xk, xv,
        params["wq_h"], params["wk_h"], params["wv_h"],
        params["bq_h"], params["bk_h"], params["bv_h"])

    # additive mask in bf16 (tiled per (q-tile, k-tile) inside the kernels)
    mask_add = jnp.where(mask == 0, -1e9, 0.0).astype(jnp.bfloat16)

    BH = B * h
    q3, k3, v3 = [a.reshape(BH, S, d_k) for a in (qh, kh, vh)]   # free reshapes

    if return_attn:
        ctx, p_attn = pallas_attention_with_probs(q3, k3, v3, mask_add)
    else:
        ctx = pallas_flash_attention(q3, k3, v3, mask_add)
        p_attn = None

    # output projection consumes head-split context directly (head reduction
    # inside the kernel -> no merge transpose); final output stays f32.
    out = pallas_output_projection(ctx.reshape(B, h, S, d_k),
                                   params["wo_h"], params["bo"])
    out = jnp.transpose(out, (1, 0, 2))                          # back to (S, B, D)
    attn = p_attn.reshape(B, h, S, S) if return_attn else None
    return out, attn


# --------------------------- Pure-JAX reference -------------------------------

def reference_mha(params, query, key, value, mask, h):
    S, B, D = query.shape
    d_k = D // h
    q = jnp.transpose(query, (1, 0, 2))
    k = jnp.transpose(key, (1, 0, 2))
    v = jnp.transpose(value, (1, 0, 2))

    def proj(x, w, b):
        y = x.reshape(B * S, D) @ w + b
        return y.reshape(B, S, h, d_k).transpose(0, 2, 1, 3)

    qh = proj(q, params["wq"], params["bq"])
    kh = proj(k, params["wk"], params["bk"])
    vh = proj(v, params["wv"], params["bv"])
    scores = jnp.einsum("bhqd,bhkd->bhqk", qh, kh) / math.sqrt(d_k)
    scores = jnp.where(mask[None, None] == 0, jnp.float32(-1e9), scores)
    p = jax.nn.softmax(scores, axis=-1)
    x = jnp.einsum("bhqk,bhkd->bhqd", p, vh)
    x = x.transpose(0, 2, 1, 3).reshape(B * S, D)
    out = (x @ params["wo"] + params["bo"].reshape(-1)).reshape(B, S, D)
    return jnp.transpose(out, (1, 0, 2)), p


# --------------------------- Demo --------------------------------------------

if __name__ == "__main__":
    d_model = 32
    h = 4
    S = 8
    B = 2

    root = jax.random.PRNGKey(0)
    kp, kq, kk, kv = jax.random.split(root, 4)

    params = init_mha_params(kp, d_model, h)

    # inputs in (S, B, d_model), matching the PyTorch module's expected layout
    query = jax.random.normal(kq, (S, B, d_model), jnp.float32)
    key_in = jax.random.normal(kk, (S, B, d_model), jnp.float32)
    value = jax.random.normal(kv, (S, B, d_model), jnp.float32)

    # causal mask (S, S); module broadcasts it as (1, 1, S, S) over batch & head
    mask = jnp.tril(jnp.ones((S, S), jnp.int32))

    # hot path: flash attention, no probability writeback
    out_fast, _ = multi_headed_attention(params, query, key_in, value, mask, h)
    out_fast = jax.block_until_ready(out_fast)

    # debug path: also materialize the probabilities (parity with self.attn)
    out_dbg, attn = multi_headed_attention(params, query, key_in, value, mask, h,
                                           return_attn=True)
    jax.block_until_ready((out_dbg, attn))

    # self-attention fast path (single activation stream into the QKV kernel)
    out_self, _ = multi_headed_attention(params, query, query, query, mask, h)
    out_self = jax.block_until_ready(out_self)

    out_ref, attn_ref = reference_mha(params, query, key_in, value, mask, h)
    out_self_ref, _ = reference_mha(params, query, query, query, mask, h)

    assert out_fast.shape == (S, B, d_model)
    assert out_dbg.shape == (S, B, d_model)
    assert attn.shape == (B, h, S, S)
    # bf16 activations + weights with f32 accumulation: ~1e-2 relative error
    # vs the f32 reference is expected.
    assert bool(jnp.allclose(out_fast, out_ref, atol=1e-1, rtol=5e-2))
    assert bool(jnp.allclose(out_dbg, out_ref, atol=1e-1, rtol=5e-2))
    assert bool(jnp.allclose(out_self, out_self_ref, atol=1e-1, rtol=5e-2))
    assert bool(jnp.allclose(attn, attn_ref, atol=5e-2, rtol=5e-2))
    assert bool(jnp.allclose(jnp.sum(attn, axis=-1), 1.0, atol=1e-2))
    assert bool(jnp.allclose(out_fast, out_dbg, atol=5e-2, rtol=5e-2))

    print("KERNEL_OK")
</pallas_src>

<mosaic_0001>
module attributes {stable_mosaic.version = 11 : i64} {
  func.func @_qkv_proj_kernel(%arg0: i32, %arg1: i32, %arg2: i32, %arg3: memref<1x8x32xbf16, #tpu.memory_space<vmem>>, %arg4: memref<1x8x32xbf16, #tpu.memory_space<vmem>>, %arg5: memref<1x8x32xbf16, #tpu.memory_space<vmem>>, %arg6: memref<4x32x8xbf16, #tpu.memory_space<vmem>>, %arg7: memref<4x32x8xbf16, #tpu.memory_space<vmem>>, %arg8: memref<4x32x8xbf16, #tpu.memory_space<vmem>>, %arg9: memref<4x1x8xf32, #tpu.memory_space<vmem>>, %arg10: memref<4x1x8xf32, #tpu.memory_space<vmem>>, %arg11: memref<4x1x8xf32, #tpu.memory_space<vmem>>, %arg12: memref<1x1x8x8xbf16, #tpu.memory_space<vmem>>, %arg13: memref<1x1x8x8xbf16, #tpu.memory_space<vmem>>, %arg14: memref<1x1x8x8xbf16, #tpu.memory_space<vmem>>) attributes {dimension_semantics = [#tpu.dimension_semantics<parallel>, #tpu.dimension_semantics<parallel>, #tpu.dimension_semantics<arbitrary>], iteration_bounds = array<i64: 2, 1, 4>, scalar_prefetch = 0 : i64, scratch_operands = 0 : i64, tpu.core_type = #tpu.core_type<tc>, window_params = [{transform_indices = @transform_0, window_bounds = array<i64: 1, 8, 32>}, {transform_indices = @transform_1, window_bounds = array<i64: 1, 8, 32>}, {transform_indices = @transform_2, window_bounds = array<i64: 1, 8, 32>}, {pipeline_mode = #tpu.pipeline_mode<synchronous>, transform_indices = @transform_3, window_bounds = array<i64: 4, 32, 8>}, {pipeline_mode = #tpu.pipeline_mode<synchronous>, transform_indices = @transform_4, window_bounds = array<i64: 4, 32, 8>}, {pipeline_mode = #tpu.pipeline_mode<synchronous>, transform_indices = @transform_5, window_bounds = array<i64: 4, 32, 8>}, {pipeline_mode = #tpu.pipeline_mode<synchronous>, transform_indices = @transform_6, window_bounds = array<i64: 4, 1, 8>}, {pipeline_mode = #tpu.pipeline_mode<synchronous>, transform_indices = @transform_7, window_bounds = array<i64: 4, 1, 8>}, {pipeline_mode = #tpu.pipeline_mode<synchronous>, transform_indices = @transform_8, window_bounds = array<i64: 4, 1, 8>}, {transform_indices = @transform_9, window_bounds = array<i64: 1, 1, 8, 8>}, {transform_indices = @transform_10, window_bounds = array<i64: 1, 1, 8, 8>}, {transform_indices = @transform_11, window_bounds = array<i64: 1, 1, 8, 8>}]} {
    %c0 = arith.constant 0 : index
    %c0_0 = arith.constant 0 : index
    %c0_1 = arith.constant 0 : index
    %0 = vector.load %arg3[%c0, %c0_0, %c0_1] : memref<1x8x32xbf16, #tpu.memory_space<vmem>>, vector<1x8x32xbf16>
    %1 = vector.shape_cast %0 : vector<1x8x32xbf16> to vector<8x32xbf16>
    %2 = arith.index_cast %arg2 : i32 to index
    %c0_2 = arith.constant 0 : index
    %c0_3 = arith.constant 0 : index
    %3 = vector.load %arg6[%2, %c0_2, %c0_3] : memref<4x32x8xbf16, #tpu.memory_space<vmem>>, vector<1x32x8xbf16>
    %4 = vector.shape_cast %3 : vector<1x32x8xbf16> to vector<32x8xbf16>
    %cst = arith.constant dense<0.000000e+00> : vector<8x8xf32>
    %5 = tpu.matmul %1, %4, %cst {dimension_numbers = #tpu.dot_dimension_numbers<[1], [0], [0], [1], [0, 0, 1, 1], [], []>} : vector<8x32xbf16>, vector<32x8xbf16>, vector<8x8xf32> -> vector<8x8xf32>
    %6 = arith.index_cast %arg2 : i32 to index
    %c0_4 = arith.constant 0 : index
    %c0_5 = arith.constant 0 : index
    %7 = vector.load %arg9[%6, %c0_4, %c0_5] : memref<4x1x8xf32, #tpu.memory_space<vmem>>, vector<1x1x8xf32>
    %8 = vector.shape_cast %7 : vector<1x1x8xf32> to vector<1x8xf32>
    %9 = vector.broadcast %8 : vector<1x8xf32> to vector<8x8xf32>
    %10 = arith.addf %5, %9 : vector<8x8xf32>
    %11 = arith.truncf %10 : vector<8x8xf32> to vector<8x8xbf16>
    %c0_6 = arith.constant 0 : index
    %c0_7 = arith.constant 0 : index
    %c0_8 = arith.constant 0 : index
    %c0_9 = arith.constant 0 : index
    %12 = vector.load %arg12[%c0_6, %c0_7, %c0_8, %c0_9] : memref<1x1x8x8xbf16, #tpu.memory_space<vmem>>, vector<1x1x8x8xbf16>
    %13 = vector.shape_cast %12 : vector<1x1x8x8xbf16> to vector<8x8xbf16>
    %14 = vector.shape_cast %11 : vector<8x8xbf16> to vector<1x1x8x8xbf16>
    tpu.vector_store %arg12[%c0_6, %c0_7, %c0_8, %c0_9], %14 {strides = array<i32>} : memref<1x1x8x8xbf16, #tpu.memory_space<vmem>>, vector<1x1x8x8xbf16>,
    %c0_10 = arith.constant 0 : index
    %c0_11 = arith.constant 0 : index
    %c0_12 = arith.constant 0 : index
    %15 = vector.load %arg4[%c0_10, %c0_11, %c0_12] : memref<1x8x32xbf16, #tpu.memory_space<vmem>>, vector<1x8x32xbf16>
    %16 = vector.shape_cast %15 : vector<1x8x32xbf16> to vector<8x32xbf16>
    %17 = arith.index_cast %arg2 : i32 to index
    %c0_13 = arith.constant 0 : index
    %c0_14 = arith.constant 0 : index
    %18 = vector.load %arg7[%17, %c0_13, %c0_14] : memref<4x32x8xbf16, #tpu.memory_space<vmem>>, vector<1x32x8xbf16>
    %19 = vector.shape_cast %18 : vector<1x32x8xbf16> to vector<32x8xbf16>
    %cst_15 = arith.constant dense<0.000000e+00> : vector<8x8xf32>
    %20 = tpu.matmul %16, %19, %cst_15 {dimension_numbers = #tpu.dot_dimension_numbers<[1], [0], [0], [1], [0, 0, 1, 1], [], []>} : vector<8x32xbf16>, vector<32x8xbf16>, vector<8x8xf32> -> vector<8x8xf32>
    %21 = arith.index_cast %arg2 : i32 to index
    %c0_16 = arith.constant 0 : index
    %c0_17 = arith.constant 0 : index
    %22 = vector.load %arg10[%21, %c0_16, %c0_17] : memref<4x1x8xf32, #tpu.memory_space<vmem>>, vector<1x1x8xf32>
    %23 = vector.shape_cast %22 : vector<1x1x8xf32> to vector<1x8xf32>
    %24 = vector.broadcast %23 : vector<1x8xf32> to vector<8x8xf32>
    %25 = arith.addf %20, %24 : vector<8x8xf32>
    %26 = arith.truncf %25 : vector<8x8xf32> to vector<8x8xbf16>
    %c0_18 = arith.constant 0 : index
    %c0_19 = arith.constant 0 : index
    %c0_20 = arith.constant 0 : index
    %c0_21 = arith.constant 0 : index
    %27 = vector.load %arg13[%c0_18, %c0_19, %c0_20, %c0_21] : memref<1x1x8x8xbf16, #tpu.memory_space<vmem>>, vector<1x1x8x8xbf16>
    %28 = vector.shape_cast %27 : vector<1x1x8x8xbf16> to vector<8x8xbf16>
    %29 = vector.shape_cast %26 : vector<8x8xbf16> to vector<1x1x8x8xbf16>
    tpu.vector_store %arg13[%c0_18, %c0_19, %c0_20, %c0_21], %29 {strides = array<i32>} : memref<1x1x8x8xbf16, #tpu.memory_space<vmem>>, vector<1x1x8x8xbf16>,
    %c0_22 = arith.constant 0 : index
    %c0_23 = arith.constant 0 : index
    %c0_24 = arith.constant 0 : index
    %30 = vector.load %arg5[%c0_22, %c0_23, %c0_24] : memref<1x8x32xbf16, #tpu.memory_space<vmem>>, vector<1x8x32xbf16>
    %31 = vector.shape_cast %30 : vector<1x8x32xbf16> to vector<8x32xbf16>
    %32 = arith.index_cast %arg2 : i32 to index
    %c0_25 = arith.constant 0 : index
    %c0_26 = arith.constant 0 : index
    %33 = vector.load %arg8[%32, %c0_25, %c0_26] : memref<4x32x8xbf16, #tpu.memory_space<vmem>>, vector<1x32x8xbf16>
    %34 = vector.shape_cast %33 : vector<1x32x8xbf16> to vector<32x8xbf16>
    %cst_27 = arith.constant dense<0.000000e+00> : vector<8x8xf32>
    %35 = tpu.matmul %31, %34, %cst_27 {dimension_numbers = #tpu.dot_dimension_numbers<[1], [0], [0], [1], [0, 0, 1, 1], [], []>} : vector<8x32xbf16>, vector<32x8xbf16>, vector<8x8xf32> -> vector<8x8xf32>
    %36 = arith.index_cast %arg2 : i32 to index
    %c0_28 = arith.constant 0 : index
    %c0_29 = arith.constant 0 : index
    %37 = vector.load %arg11[%36, %c0_28, %c0_29] : memref<4x1x8xf32, #tpu.memory_space<vmem>>, vector<1x1x8xf32>
    %38 = vector.shape_cast %37 : vector<1x1x8xf32> to vector<1x8xf32>
    %39 = vector.broadcast %38 : vector<1x8xf32> to vector<8x8xf32>
    %40 = arith.addf %35, %39 : vector<8x8xf32>
    %41 = arith.truncf %40 : vector<8x8xf32> to vector<8x8xbf16>
    %c0_30 = arith.constant 0 : index
    %c0_31 = arith.constant 0 : index
    %c0_32 = arith.constant 0 : index
    %c0_33 = arith.constant 0 : index
    %42 = vector.load %arg14[%c0_30, %c0_31, %c0_32, %c0_33] : memref<1x1x8x8xbf16, #tpu.memory_space<vmem>>, vector<1x1x8x8xbf16>
    %43 = vector.shape_cast %42 : vector<1x1x8x8xbf16> to vector<8x8xbf16>
    %44 = vector.shape_cast %41 : vector<8x8xbf16> to vector<1x1x8x8xbf16>
    tpu.vector_store %arg14[%c0_30, %c0_31, %c0_32, %c0_33], %44 {strides = array<i32>} : memref<1x1x8x8xbf16, #tpu.memory_space<vmem>>, vector<1x1x8x8xbf16>,
    return
  }
  func.func @transform_0(%arg0: i32, %arg1: i32, %arg2: i32) -> (i32, i32, i32) {
    %c0_i32 = arith.constant 0 : i32
    %c0_i32_0 = arith.constant 0 : i32
    return %arg0, %arg1, %c0_i32 : i32, i32, i32
  }
  func.func @transform_1(%arg0: i32, %arg1: i32, %arg2: i32) -> (i32, i32, i32) {
    %c0_i32 = arith.constant 0 : i32
    %c0_i32_0 = arith.constant 0 : i32
    return %arg0, %arg1, %c0_i32 : i32, i32, i32
  }
  func.func @transform_2(%arg0: i32, %arg1: i32, %arg2: i32) -> (i32, i32, i32) {
    %c0_i32 = arith.constant 0 : i32
    %c0_i32_0 = arith.constant 0 : i32
    return %arg0, %arg1, %c0_i32 : i32, i32, i32
  }
  func.func @transform_3(%arg0: i32, %arg1: i32, %arg2: i32) -> (i32, i32, i32) {
    %c0_i32 = arith.constant 0 : i32
    %c0_i32_0 = arith.constant 0 : i32
    %c0_i32_1 = arith.constant 0 : i32
    %c0_i32_2 = arith.constant 0 : i32
    return %c0_i32, %c0_i32_0, %c0_i32_1 : i32, i32, i32
  }
  func.func @transform_4(%arg0: i32, %arg1: i32, %arg2: i32) -> (i32, i32, i32) {
    %c0_i32 = arith.constant 0 : i32
    %c0_i32_0 = arith.constant 0 : i32
    %c0_i32_1 = arith.constant 0 : i32
    %c0_i32_2 = arith.constant 0 : i32
    return %c0_i32, %c0_i32_0, %c0_i32_1 : i32, i32, i32
  }
  func.func @transform_5(%arg0: i32, %arg1: i32, %arg2: i32) -> (i32, i32, i32) {
    %c0_i32 = arith.constant 0 : i32
    %c0_i32_0 = arith.constant 0 : i32
    %c0_i32_1 = arith.constant 0 : i32
    %c0_i32_2 = arith.constant 0 : i32
    return %c0_i32, %c0_i32_0, %c0_i32_1 : i32, i32, i32
  }
  func.func @transform_6(%arg0: i32, %arg1: i32, %arg2: i32) -> (i32, i32, i32) {
    %c0_i32 = arith.constant 0 : i32
    %c0_i32_0 = arith.constant 0 : i32
    %c0_i32_1 = arith.constant 0 : i32
    %c0_i32_2 = arith.constant 0 : i32
    return %c0_i32, %c0_i32_0, %c0_i32_1 : i32, i32, i32
  }
  func.func @transform_7(%arg0: i32, %arg1: i32, %arg2: i32) -> (i32, i32, i32) {
    %c0_i32 = arith.constant 0 : i32
    %c0_i32_0 = arith.constant 0 : i32
    %c0_i32_1 = arith.constant 0 : i32
    %c0_i32_2 = arith.constant 0 : i32
    return %c0_i32, %c0_i32_0, %c0_i32_1 : i32, i32, i32
  }
  func.func @transform_8(%arg0: i32, %arg1: i32, %arg2: i32) -> (i32, i32, i32) {
    %c0_i32 = arith.constant 0 : i32
    %c0_i32_0 = arith.constant 0 : i32
    %c0_i32_1 = arith.constant 0 : i32
    %c0_i32_2 = arith.constant 0 : i32
    return %c0_i32, %c0_i32_0, %c0_i32_1 : i32, i32, i32
  }
  func.func @transform_9(%arg0: i32, %arg1: i32, %arg2: i32) -> (i32, i32, i32, i32) {
    %c0_i32 = arith.constant 0 : i32
    %c0_i32_0 = arith.constant 0 : i32
    return %arg0, %arg2, %arg1, %c0_i32 : i32, i32, i32, i32
  }
  func.func @transform_10(%arg0: i32, %arg1: i32, %arg2: i32) -> (i32, i32, i32, i32) {
    %c0_i32 = arith.constant 0 : i32
    %c0_i32_0 = arith.constant 0 : i32
    return %arg0, %arg2, %arg1, %c0_i32 : i32, i32, i32, i32
  }
  func.func @transform_11(%arg0: i32, %arg1: i32, %arg2: i32) -> (i32, i32, i32, i32) {
    %c0_i32 = arith.constant 0 : i32
    %c0_i32_0 = arith.constant 0 : i32
    return %arg0, %arg2, %arg1, %c0_i32 : i32, i32, i32, i32
  }
}

</mosaic_0001>

<bundles_post_ra>
// kernel: tpu_custom_call.1
= control target key start
LH: loop header
LB: loop body
LE: loop exit
PB: predicated region body
PF: predicated region fallthrough
CT: control target
= control target key end

     0   :  { %s1605_s0 = inlined_call_operand.vmem [shape: bf16[2,8,32], index: 0, kind: input, shape index: {}]   ;;  %s1606_s1 = inlined_call_operand.vmem [shape: bf16[2,8,32], index: 1, kind: input, shape index: {}]   ;;  %s1607_s2 = inlined_call_operand.vmem [shape: bf16[2,8,32], index: 2, kind: input, shape index: {}]   ;;  %s1608_s3 = inlined_call_operand.vmem [shape: bf16[4,32,8], index: 3, kind: input, shape index: {}]   ;;  %s1609_s4 = inlined_call_operand.vmem [shape: bf16[4,32,8], index: 4, kind: input, shape index: {}]   ;;  %s1610_s5 = inlined_call_operand.vmem [shape: bf16[4,32,8], index: 5, kind: input, shape index: {}]   ;;  %s1611_s6 = inlined_call_operand.vmem [shape: f32[4,1,8], index: 6, kind: input, shape index: {}]   ;;  %s1612_s7 = inlined_call_operand.vmem [shape: f32[4,1,8], index: 7, kind: input, shape index: {}]   ;;  %s1613_s8 = inlined_call_operand.vmem [shape: f32[4,1,8], index: 8, kind: input, shape index: {}]   ;;  %s1614_s9 = inlined_call_operand.hbm [shape: bf16[2,4,8,8], index: 9, kind: output, shape index: {0}]   ;;  %s1615_s10 = inlined_call_operand.hbm [shape: bf16[2,4,8,8], index: 10, kind: output, shape index: {1}]   ;;  %s1616_s11 = inlined_call_operand.hbm [shape: bf16[2,4,8,8], index: 11, kind: output, shape index: {2}]  }
   0x1   :  { %1624 = sst [smem:[#allocation14_spill]] %s1605_s0 }
   0x2   :  { %1625 = sst [smem:[#allocation15_spill]] %s1606_s1 }
   0x3   :  { %1626 = sst [smem:[#allocation16_spill]] %s1608_s3 }
   0x4   :  { %1627 = sst [smem:[#allocation17_spill]] %s1609_s4 }
   0x5   :  { %17 = vsyncpa [#allocation3], 0 }
   0x6   :  { %19 = vsyncpa [#allocation3 + $0x1], 0 }
   0x7   :  { %20 = vsyncpa [#allocation5], 0 }
   0x8   :  { %22 = vsyncpa [#allocation5 + $0x1], 0  ;;  %s1346_s17 = smov 0   ;;  %s1348_s18 = smov 0  }
   0x9   :  { %s1350_s19 = smov 0   ;;  %s1352_s20 = smov 0  }
   0xa   :  { %s1354_s21 = smov 0   ;;  %s1356_s22 = smov 0  }
   0xb   :  { %s1358_s23 = smov 0   ;;  %s1360_s24 = smov 0  }
   0xc LB: > { %1628 = sst [smem:[#allocation9_spill]] %s1271_s22  ;;  %s1618_s25 = sadd.s32 4294967295, %s1279_s24   ;;  %s1279_s24 = sphi %s1360_s24, %s28_s24   ;;  %s1275_s23 = sphi %s1358_s23, %s1646_s23   ;;  %s1271_s22 = sphi %s1356_s22, %s1645_s22   ;;  %s1267_s21 = sphi %s1354_s21, %s1644_s21   ;;  %s1263_s20 = sphi %s1352_s20, %s1643_s20   ;;  %s1259_s19 = sphi %s1350_s19, %s1649_s19   ;;  %s1255_s18 = sphi %s1348_s18, %s1648_s18   ;;  %s1251_s17 = sphi %s1346_s17, %s1647_s17  }
   0xd   : > { %1629 = sst [smem:[#allocation10_spill]] %s1275_s23  ;;  %s1617_s26 = sadd.s32 4294967294, %s1279_s24  }
   0xe   : > { %s40_s27 = sadd.s32 1, %s1271_s22  ;;  %s47_s28 = sadd.s32 1, %s1275_s23 }
   0xf   : > { %p41_p0 = scmp.ge.s32.totalorder %s40_s27, 4  ;;  %p278_p1 = scmp.ne.s32.totalorder %s1259_s19, %s1255_s18 }
  0x10   : > { %p279_p2 = scmp.eq.s32.totalorder %s1618_s25, 7  ;;  %p284_p5 = scmp.ne.s32.totalorder %s1255_s18, %s1251_s17 }
  0x11   : > { %s1651_s27 = smov (%p41_p0, %s40_s27), 0  ;;  %s1653_s28 = smov (!%p41_p0, %s47_s28), %s1275_s23 }
  0x12   : > { %1630 = sst [smem:[#allocation11_spill]] %s1651_s27  ;;  %s262_s29 = ssub.s32 %s1271_s22, %s1651_s27 }
  0x13   : > { %p1399_p3 = por %p279_p2, %p278_p1  ;;  %p49_p4 = scmp.ge.s32.totalorder %s1653_s28, 2 }
  0x14   : > { %p285_p6 = scmp.eq.s32.totalorder %s1617_s26, 7  ;;  %p966_p7 = scmp.ge.s32.totalorder %s1279_s24, 1 }
  0x15   : > { %s1655_s28 = smov (%p49_p4, %s1653_s28), 0  ;;  %p411_p9 = scmp.lt.s32.totalorder %s1279_s24, 9 }
  0x16   : > { %1632 = sst [smem:[#allocation12_spill]] %s1655_s28  ;;  %p1410_p8 = por %p285_p6, %p284_p5 }
  0x17   : > { %s261_s13 = ssub.s32 %s1275_s23, %s1655_s28  ;;  %s268_s14 = sadd.s32 1, %s1259_s19 }
  0x18   : > { %s263_s15 = sor.u32 %s262_s29, %s261_s13  ;;  %p412_p10 = pnand %p966_p7, %p411_p9 }
  0x19   : > { %p266_p11 = scmp.eq.s32.totalorder %s263_s15, 0  ;;  %s1000_s26 = sshll.u32 (!%p412_p10), %s1263_s20, 4  ;;  %v1281_v0 = vmov (!%p412_p10), 0.0   ;;  %vm1282_vm0 = vmmov (!%p412_p10), 0   ;;  %vm527_vm1 = vcmask (!%p412_p10), 261120   ;;  %vm572_vm2 = vcmask (!%p412_p10), 60416  }
  0x1a   : > { %415 = sbr.rel (%p412_p10) target bundleno = 320 (0x140), region = 56  ;;  %p477_p12 = scmp.lt.s32.totalorder (!%p412_p10), %s1267_s21, 1  ;;  %1012 = vmatprep.subr.bf16.mxu0 (!%p412_p10), %v1281_v0  ;;  %1020 = vmatprep.subr.bf16.mxu1 (!%p412_p10), %v1281_v0 }
  0x1b   : > { %s1419_s16 = scalar_select %p266_p11, %s1259_s19, %s268_s14  }
  0x1c   : > { %s1635_s3 = sld [smem:[#allocation16_spill]] (!%p412_p10)  ;;  %s1636_s4 = sld [smem:[#allocation17_spill]] (!%p412_p10)  ;;  %1016 = vmatprep.mubr.msk.bf16.mxu0 (!%p412_p10), %vm1282_vm0, %v1281_v0  ;;  %1024 = vmatprep.mubr.msk.bf16.mxu1 (!%p412_p10), %vm1282_vm0, %v1281_v0 }
  0x1d   : > { %1634 = sst [smem:[#allocation13_spill]] %s1419_s16  ;;  %s648_s16 = scalar_lea.vmem (!%p412_p10), %s1610_s5, %s1000_s26 }
  0x1e   : > { %s1637_s0 = sld [smem:[#allocation14_spill]] (!%p412_p10)  ;;  %s1638_s1 = sld [smem:[#allocation15_spill]] (!%p412_p10)  ;;  %v1122_v6 = vld [vmem:[%s648_s16] sm:$0xff] (!%p412_p10)   ;;  %v1124_v8 = vld [vmem:[%s648_s16 + $0x8] sm:$0xff] (!%p412_p10)  }
  0x1f   : > { %s507_s27 = scalar_lea.vmem (!%p412_p10), %s1611_s6, %s1263_s20  ;;  %s653_s15 = scalar_lea.vmem (!%p412_p10), %s1613_s8, %s1263_s20 }
  0x20   : > { %v975_v10 = vld [vmem:[%s507_s27] ss:$0 sm:$0xff] (!%p412_p10) }
  0x21   : > { %s478_s14 = scalar_select %p477_p12, %s1267_s21, 1  ;;  %v985_v24 = vld [vmem:[%s653_s15] ss:$0 sm:$0xff] }
  0x22   : > { %s502_s22 = scalar_lea.vmem %s1635_s3, %s1000_s26  ;;  %s576_s13 = scalar_lea.vmem %s1636_s4, %s1000_s26 }
  0x23   : > { %v1119_v1 = vld [vmem:[%s502_s22] sm:$0xff]   ;;  %v1120_v2 = vld [vmem:[%s502_s22 + $0x8] sm:$0xff]   ;;  %s970_s25 = sshll.u32 %s478_s14, 2  ;;  %s460_s26 = sand.u32 1, %s1255_s18  }
  0x24   : > { %1013 = vmatpush3.bf16.msra.mxu0 %v1119_v1  ;;  %v1121_v3 = vld [vmem:[%s576_s13] sm:$0xff]   ;;  %s483_s28 = scalar_lea.vmem %s1637_s0, %s970_s25  ;;  %v1123_v4 = vld [vmem:[%s576_s13 + $0x8] sm:$0xff]   ;;  %s490_s22 = scalar_lea.vmem %s1638_s1, %s970_s25 }
  0x25   : > { %1014 = vmatprep.subr.bf16.mxu0 %v1281_v0  ;;  %1021 = vmatpush3.bf16.msra.mxu1 %v1121_v3  ;;  %v499_v5 = vld [vmem:[%s483_s28] sm:$0xf]  ;;  %s497_s23 = scalar_lea.vmem %s1607_s2, %s970_s25  ;;  %s992_s13 = sshll.u32 %s1267_s21, 2 }
  0x26   : > { %1022 = vmatprep.subr.bf16.mxu1 %v1281_v0  ;;  %v574_v7 = vld [vmem:[%s490_s22] sm:$0xf]  ;;  %s1453_s16 = sshll.u32 %s460_s26, 2  ;;  %s581_s25 = scalar_lea.vmem %s1612_s7, %s1263_s20 }
  0x27   : > { %v646_v9 = vld [vmem:[%s497_s23] sm:$0xf]  ;;  %s741_s22 = sadd.s32 %s1263_s20, %s992_s13  ;;  %s462_s21 = scalar_lea.vmem [#allocation2], %s1453_s16 }
  0x28   : > { %1015 = vmatpush3.bf16.msra.mxu0 %v1120_v2  ;;  %v980_v12 = vld [vmem:[%s581_s25] ss:$0 sm:$0xff]  ;;  %s1460_s3 = sshll.u32 %s741_s22, 6  ;;  %s745_s4 = sshll.u32 %s462_s21, 4  ;;  %s1480_s4 = int_to_ptr.vmem [resolvable:$true] %s745_s4 }
  0x29   : > { %1028 = vmatprep.subr.bf16.mxu0 %v1281_v0  ;;  %1023 = vmatpush3.bf16.msra.mxu1 %v1123_v4  ;;  %s1639_s28 = sadd.s32 4294967295, %s1279_s24   ;;  %s1623_s13 = scalar_lea.vmem [#allocation4], %s1453_s16 }
  0x2a   : > { %s1469_s29 = sand.u32 1, %s1639_s28   ;;  %s761_s27 = sshll.u32 %s1623_s13, 4  ;;  %s1488_s27 = int_to_ptr.vmem [resolvable:$true] %s761_s27 }
  0x2b   : > { %1017 = vmatmul.mubr.msk.bf16.vlgmr.msra.gmra.mrb[0].mxu0 %vm527_vm1, %v499_v5  ;;  %s1478_s20 = scalar_lea.hbm %s1614_s9, %s1460_s3  ;;  %s1486_s28 = scalar_lea.hbm %s1615_s10, %s1460_s3 }
  0x2c   : > { %1029 = vmatpush3.bf16.msra.mxu0 %v1122_v6  ;;  %1032 = vmatprep.mubr.msk.bf16.mxu0 %vm1282_vm0, %v1281_v0  ;;  %s719_s25 = scalar_lea.sflag [#allocation3], %s460_s26  ;;  %s1125_s22 = scalar_lea.vmem %s1480_s4, 64 }
  0x2d   : > { %1030 = vmatprep.subr.bf16.mxu0 %v1281_v0  ;;  %1025 = vmatmul.mubr.msk.bf16.vlgmr.msra.gmra.mrb[0].mxu1 %vm527_vm1, %v574_v7  ;;  %p1126_p13 = scmp.ne.s32.totalorder %s1480_s4, %s1125_s22  ;;  %s1283_s13 = smov [#allocation2]  }
  0x2e   : > { %s1129_s0 = sshll.u32 %s1283_s13, 4  ;;  %s1130_s0 = int_to_ptr.vmem [resolvable:$false] %s1129_s0 }
  0x2f   : > { %p1127_p0 = pnand %p1126_p13, %p1399_p3  ;;  %s1131_s1 = scalar_lea.vmem %s1130_s0, 128 }
  0x30   : > { %1031 = vmatpush3.bf16.msra.mxu0 %v1124_v8  ;;  %p1132_p2 = scmp.lt.s32.totalorder %s1480_s4, %s1130_s0  ;;  %p1133_p4 = scmp.lt.s32.totalorder %s1131_s1, %s1125_s22 }
  0x31   : > { %p1128_p1 = pneg %p1127_p0 }
  0x32   : > { %p1134_p5 = por %p1133_p4, %p1132_p2 }
  0x33   : > { %1033 = vmatmul.mubr.msk.bf16.vlgmr.msra.gmra.mrb[4].mxu0 %vm527_vm1, %v646_v9 }
  0x34   : > { %p1135_p6 = pnand %p1134_p5, %p1128_p1 }
  0xfe   : > { %v565_v11 = vpop.f32.mrb[0].mxu0 }
  0xff   : > { %v566_v13 = vadd.f32 %v975_v10, %v565_v11  ;;  %v1018_v14 = vpop.f32.mrb[1].mxu0 }
 0x100   : > { %v568_v15 = vpop.f32.mrb[2].mxu0  ;;  %v638_v16 = vpop.f32.mrb[0].mxu1 }
 0x101   : > { %v571_v17 = vpack.c.bf16 %v566_v13, %v566_v13  ;;  %v1019_v18 = vpop.f32.mrb[3].mxu0  ;;  %v639_v19 = vadd.f32 %v980_v12, %v638_v16  ;;  %v1026_v20 = vpop.f32.mrb[1].mxu1 }
 0x102   : > { %v641_v21 = vpop.f32.mrb[2].mxu1 }
 0x103   : > { %v644_v22 = vpack.c.bf16 %v639_v19, %v639_v19  ;;  %v1027_v23 = vpop.f32.mrb[3].mxu1  ;;  %573 = vst.msk [vmem:[%s462_s21] sm:$0xf] %vm572_vm2, %v571_v17 }
 0x104   : > { %1138 = shalt.err (!%p1135_p6)
}
 0x105   : > { %s1139_s26 = scalar_lea.hbm %s1478_s20, 64  ;;  %s1143_s13 = scalar_lea.hbm %s1614_s9, 512 }
 0x106   : > { %p1140_p7 = scmp.ne.s32.totalorder %s1478_s20, %s1139_s26  ;;  %p1144_p11 = scmp.lt.u32.totalorder %s1478_s20, %s1614_s9 }
 0x107   : > { %p1145_p12 = scmp.lt.u32.totalorder %s1143_s13, %s1139_s26  ;;  %p1147_p0 = scmp.lt.u32.totalorder %s1139_s26, %s1478_s20 }
 0x108   : > { %p1141_p9 = pnand %p1140_p7, %p1399_p3 }
 0x109   : > { %p1146_p13 = por %p1145_p12, %p1144_p11 }
 0x10a   : > { %p1142_p10 = pneg %p1141_p9 }
 0x10b   : > { %p1148_p1 = por %p1147_p0, %p1146_p13 }
 0x10d   : > { %p1149_p2 = pnand %p1148_p1, %p1142_p10 }
 0x10f   : > { %1152 = shalt.err (!%p1149_p2)
}
 0x110   : > { %1036 = dma.vmem_to_hbm [thread:$0]  (%p1399_p3), %s1480_s4, 64, %s1478_s20, %s719_s25   ;;  %v710_v25 = vpop.f32.mrb[4].mxu0 }
 0x111   : > { %s1640_s1 = scalar_lea.vmem [#allocation4], %s1453_s16  ;;  %s476_s14 = scalar_lea.vmem [#allocation6], %s1453_s16 }
 0x112   : > { %645 = vst.msk [vmem:[%s1640_s1] sm:$0xf] %vm572_vm2, %v644_v22  ;;  %s1520_s22 = sshll.u32 %s476_s14, 4  ;;  %s724_s26 = scalar_lea.sflag [#allocation5], %s1469_s29  ;;  %s778_s22 = int_to_ptr.vmem [resolvable:$true] %s1520_s22 }
 0x113   : > { %s1153_s21 = scalar_lea.vmem %s1488_s27, 64  ;;  %s1284_s15 = smov [#allocation4]  }
 0x114   : > { %p1154_p4 = scmp.ne.s32.totalorder %s1488_s27, %s1153_s21  ;;  %s1157_s13 = sshll.u32 %s1284_s15, 4  ;;  %s1158_s13 = int_to_ptr.vmem [resolvable:$false] %s1157_s13 }
 0x115   : > { %s1159_s23 = scalar_lea.vmem %s1158_s13, 128  ;;  %p1160_p7 = scmp.lt.s32.totalorder %s1488_s27, %s1158_s13 }
 0x116   : > { %p1155_p5 = pnand %p1154_p4, %p1399_p3  ;;  %p1161_p9 = scmp.lt.s32.totalorder %s1159_s23, %s1153_s21 }
 0x118   : > { %p1156_p6 = pneg %p1155_p5  ;;  %p1162_p10 = por %p1161_p9, %p1160_p7 }
 0x11a   : > { %p1163_p11 = pnand %p1162_p10, %p1156_p6 }
 0x11c   : > { %1166 = shalt.err (!%p1163_p11)
}
 0x11d   : > { %s1167_s4 = scalar_lea.hbm %s1486_s28, 64  ;;  %s1171_s0 = scalar_lea.hbm %s1615_s10, 512 }
 0x11e   : > { %p1168_p12 = scmp.ne.s32.totalorder %s1486_s28, %s1167_s4  ;;  %p1172_p1 = scmp.lt.u32.totalorder %s1486_s28, %s1615_s10 }
 0x11f   : > { %p1173_p2 = scmp.lt.u32.totalorder %s1171_s0, %s1167_s4  ;;  %p1175_p5 = scmp.lt.u32.totalorder %s1167_s4, %s1486_s28 }
 0x120   : > { %p1169_p13 = pnand %p1168_p12, %p1399_p3 }
 0x121   : > { %p1174_p4 = por %p1173_p2, %p1172_p1 }
 0x122   : > { %p1170_p0 = pneg %p1169_p13 }
 0x123   : > { %p1176_p6 = por %p1175_p5, %p1174_p4 }
 0x125   : > { %p1177_p7 = pnand %p1176_p6, %p1170_p0 }
 0x127   : > { %1180 = shalt.err (!%p1177_p7)
}
 0x128   : > { %1037 = dma.vmem_to_hbm [thread:$0]  (%p1399_p3), %s1488_s27, 64, %s1486_s28, %s724_s26   ;;  %v711_v26 = vadd.f32 %v985_v24, %v710_v25  ;;  %v1034_v27 = vpop.f32.mrb[5].mxu0 }
 0x129   : > { %v713_v28 = vpop.f32.mrb[6].mxu0  ;;  %s1550_s23 = scalar_lea.hbm %s1616_s11, %s1460_s3  ;;  %s1181_s4 = scalar_lea.vmem %s778_s22, 64 }
 0x12a   : > { %v716_v29 = vpack.c.bf16 %v711_v26, %v711_v26  ;;  %v1035_v30 = vpop.f32.mrb[7].mxu0  ;;  %p1182_p9 = scmp.ne.s32.totalorder %s778_s22, %s1181_s4  ;;  %s1285_s27 = smov [#allocation6]  }
 0x12b   : > { %s1185_s28 = sshll.u32 %s1285_s27, 4  ;;  %s1186_s28 = int_to_ptr.vmem [resolvable:$false] %s1185_s28 }
 0x12c   : > { %717 = vst.msk [vmem:[%s476_s14] sm:$0xf] %vm572_vm2, %v716_v29  ;;  %p1183_p10 = pnand %p1182_p9, %p1399_p3  ;;  %s1187_s20 = scalar_lea.vmem %s1186_s28, 128 }
 0x12d   : > { %p1188_p12 = scmp.lt.s32.totalorder %s778_s22, %s1186_s28  ;;  %p1189_p13 = scmp.lt.s32.totalorder %s1187_s20, %s1181_s4 }
 0x12e   : > { %p1184_p11 = pneg %p1183_p10 }
 0x12f   : > { %p1190_p0 = por %p1189_p13, %p1188_p12 }
 0x131   : > { %p1191_p1 = pnand %p1190_p0, %p1184_p11 }
 0x133   : > { %1194 = shalt.err (!%p1191_p1)
}
 0x134   : > { %s1195_s16 = scalar_lea.hbm %s1550_s23, 64  ;;  %s1199_s25 = scalar_lea.hbm %s1616_s11, 512 }
 0x135   : > { %p1196_p2 = scmp.ne.s32.totalorder %s1550_s23, %s1195_s16  ;;  %p1200_p6 = scmp.lt.u32.totalorder %s1550_s23, %s1616_s11 }
 0x136   : > { %p1201_p7 = scmp.lt.u32.totalorder %s1199_s25, %s1195_s16  ;;  %p1203_p10 = scmp.lt.u32.totalorder %s1195_s16, %s1550_s23 }
 0x137   : > { %p1197_p4 = pnand %p1196_p2, %p1399_p3 }
 0x138   : > { %p1202_p9 = por %p1201_p7, %p1200_p6 }
 0x139   : > { %p1198_p5 = pneg %p1197_p4 }
 0x13a   : > { %p1204_p11 = por %p1203_p10, %p1202_p9 }
 0x13c   : > { %p1205_p12 = pnand %p1204_p11, %p1198_p5 }
 0x13e   : > { %1208 = shalt.err (!%p1205_p12)
}
 0x13f   : > { %1038 = dma.vmem_to_hbm [thread:$0]  (%p1399_p3), %s778_s22, 64, %s1550_s23, %s724_s26  }
 0x140 PF: > { %p1052_p13 = scmp.ge.s32.totalorder %s1279_s24, 2  ;;  %s789_s15 = sand.u32 1, %s1251_s17  }
 0x141   : > { %s790_s21 = scalar_lea.sflag [#allocation3], %s789_s15 }
 0x142   : > { %p1043_p0 = pnand %p1052_p13, %p1410_p8 }
 0x144   : > { %1242 = dma.done.wait (!%p1043_p0), %s790_s21, 64  }
 0x145   : > { %1244 = vsyncadd (!%p1043_p0), %s790_s21, 4294967232  ;;  %s1641_s13 = sadd.s32 4294967294, %s1279_s24  }
 0x146   : > { %s798_s4 = sand.u32 1, %s1641_s13  }
 0x147   : > { %s799_s27 = scalar_lea.sflag [#allocation5], %s798_s4 }
 0x148   : > { %1246 = dma.done.wait (!%p1043_p0), %s799_s27, 128  }
 0x149   : > { %1248 = vsyncadd (!%p1043_p0), %s799_s27, 4294967168  ;;  %s28_s24 = sadd.s32 1, %s1279_s24   ;;  %s1642_s30 = sld [smem:[#allocation13_spill]] }
 0x14a   : > { %p25_p3 = scmp.ge.s32.totalorder %s28_s24, 10   ;;  %s1643_s20 = sld [smem:[#allocation9_spill]] }
 0x14b   : > { %s1644_s21 = sld [smem:[#allocation10_spill]]  ;;  %s1645_s22 = sld [smem:[#allocation11_spill]] }
 0x14c   : > { %s1646_s23 = sld [smem:[#allocation12_spill]]  ;;  %s1647_s17 = smov %s1255_s18 }
 0x14d   : > { %s1648_s18 = smov %s1259_s19  ;;  %27 = sbr.rel (!%p25_p3) target bundleno = 12 (0xc), region = 135 }
 0x14f   : > { %s1649_s19 = smov %s1642_s30 }
 0x154   :  { %813 = vsyncpa [#allocation3], 1 }
 0x155   :  { %815 = vsyncpa [#allocation3 + $0x1], 1 }
 0x156   :  { %816 = vsyncpa [#allocation5], 1 }
 0x157   :  { %818 = vsyncpa [#allocation5 + $0x1], 1 }

</bundles_post_ra>
